<compile_context>
chip_gen: v7x
topology: tpu7x:2x2x1
jax: 0.10.0
libtpu: 0.0.40
codegen_flags: <defaults>
</compile_context>

<pallas_src>
import math

import jax
import jax.numpy as jnp
from jax.experimental import pallas as pl
from jax.experimental.pallas import tpu as pltpu


# ----------------------------- kernels --------------------------------------
def _scale_kernel(x_ref, g_ref, o_ref):
    # x_ref: (tr, D_eff), g_ref: (1, D_eff). Broadcast multiply on the VPU;
    # promotion happens in the multiply, then cast to the output dtype.
    o_ref[...] = (x_ref[...] * g_ref[...]).astype(o_ref.dtype)


def _scale_residual_kernel(x_ref, r_ref, g_ref, o_ref):
    # Fused residual add: out = residual + gamma * x (one HBM pass for the pair).
    o_ref[...] = (r_ref[...] + x_ref[...] * g_ref[...]).astype(o_ref.dtype)


# ----------------------------- tiling helpers -------------------------------
_MIN_STEPS = 4  # >=4 grid steps keeps the pipeline busy and both v7x TCs loaded


def _default_block_bytes():
    """Per-generation DMA block target."""
    try:
        kind = jax.devices()[0].device_kind.lower()
    except Exception:  # pragma: no cover - defensive
        return 2 << 20
    if any(tag in kind for tag in ("v6", "v7", "trillium")):
        return 4 << 20  # fits 32 MiB scoped default double-buffered on v6e/v7x
    return 2 << 20      # safe under v5e's 16 MiB scoped VMEM default


def _choose_row_tile(r_eff, bytes_per_row, pack, target_block_bytes):
    """Pick the row tile: ~target bytes per block, multiple of `pack`,
    but never a single-step grid when the array has >1 packed row group."""
    if r_eff <= pack:
        return r_eff  # full-extent first dim is always legal (tiny, masked-free)
    tr = max(pack, (target_block_bytes // max(1, bytes_per_row)) // pack * pack)
    max_steps = pl.cdiv(r_eff, pack)              # finest legal tiling
    steps = min(max(_MIN_STEPS, pl.cdiv(r_eff, tr)), max_steps)
    if steps % 2 and steps < max_steps:
        steps += 1                                # even count: balanced v7x TC split
    tr = max(pack, pl.cdiv(pl.cdiv(r_eff, steps), pack) * pack)
    return min(tr, pl.cdiv(r_eff, pack) * pack)


# ----------------------------- 2-D driver ------------------------------------
def _scaled_2d(x2, gamma_row, r2, *, target_block_bytes, donate_x):
    """x2: (R_eff, D_eff); gamma_row: (1, D_eff); r2: optional (R_eff, D_eff)."""
    r_eff, d_eff = x2.shape
    itemsize = jnp.dtype(x2.dtype).itemsize
    pack = max(8, 32 // itemsize)  # sublane packing: 8 (4B) / 16 (2B) / 32 (1B)
    tr = _choose_row_tile(r_eff, d_eff * itemsize, pack, target_block_bytes)
    grid = (pl.cdiv(r_eff, tr),)   # ragged last block handled by Pallas masking

    row_spec = pl.BlockSpec((tr, d_eff), lambda i: (i, 0))
    g_spec = pl.BlockSpec((1, d_eff), lambda i: (0, 0))  # resident across steps

    fused = r2 is not None
    operands = [x2] + ([r2] if fused else []) + [gamma_row]
    in_specs = [row_spec] + ([row_spec] if fused else []) + [g_spec]
    kernel = _scale_residual_kernel if fused else _scale_kernel

    n_streams = 3 if fused else 2  # x (+ residual) + out
    bytes_hbm = (n_streams * r_eff * d_eff * itemsize
                 + d_eff * jnp.dtype(gamma_row.dtype).itemsize)
    flops = r_eff * d_eff * (2 if fused else 1)

    # double-buffered streams + gamma + slack; capped under v7x physical VMEM
    vmem_need = n_streams * 2 * tr * d_eff * itemsize + d_eff * 4 + (1 << 20)
    vmem_limit = int(min(48 << 20, max(16 << 20, vmem_need)))

    return pl.pallas_call(
        kernel,
        out_shape=jax.ShapeDtypeStruct((r_eff, d_eff), x2.dtype),
        grid_spec=pltpu.PrefetchScalarGridSpec(
            num_scalar_prefetch=0,
            grid=grid,
            in_specs=in_specs,
            out_specs=row_spec,
        ),
        compiler_params=pltpu.CompilerParams(
            dimension_semantics=("parallel",),
            vmem_limit_bytes=vmem_limit,
        ),
        cost_estimate=pl.CostEstimate(
            flops=flops, transcendentals=0, bytes_accessed=bytes_hbm),
        input_output_aliases=({0: 0} if donate_x else {}),
    )(*operands)


# ----------------------------- public wrapper --------------------------------
def layer_scale(x, gamma, residual=None, *, target_block_bytes=None,
                donate_x=False):
    """out = x * gamma (per-channel), optionally fused as residual + x * gamma.

    x: (..., D), gamma: (D,), residual: optional, same shape as x.
    Returns x's shape and dtype.
    """
    orig_shape = x.shape
    d = orig_shape[-1]
    gamma = gamma.reshape(-1)
    assert gamma.shape[0] == d
    if residual is not None:
        assert residual.shape == orig_shape

    if target_block_bytes is None:
        target_block_bytes = _default_block_bytes()

    x2 = x.reshape(-1, d)  # glue reshape only (no copy)
    r2 = residual.reshape(-1, d) if residual is not None else None
    rows = x2.shape[0]
    if rows == 0 or d == 0:  # degenerate, nothing to compute
        empty = x * gamma if residual is None else residual + x * gamma
        return empty.astype(x.dtype)

    def _run(x_part, r_part):
        # lane-dense folding: make the last (lane) dim a multiple of 128 when
        # the row count allows it (full-width vst instead of masked vst.msk).
        r_p = x_part.shape[0]
        m = 1
        if d % 128 != 0:
            m_need = 128 // math.gcd(d, 128)
            if r_p % m_need == 0:
                m = m_need
        d_eff = m * d
        xf = x_part.reshape(r_p // m, d_eff)
        rf = r_part.reshape(r_p // m, d_eff) if r_part is not None else None
        gf = (jnp.tile(gamma, m) if m > 1 else gamma).reshape(1, d_eff)
        out = _scaled_2d(xf, gf, rf, target_block_bytes=target_block_bytes,
                         donate_x=donate_x)
        return out.reshape(r_p, d)

    m_needed = 1 if d % 128 == 0 else 128 // math.gcd(d, 128)
    if m_needed > 1 and rows % m_needed != 0 and rows > m_needed:
        # Largest lane-dense prefix + tiny (< m_needed rows) masked tail, then
        # stitch. Avoids dropping the whole tensor onto the masked-store path.
        r_main = (rows // m_needed) * m_needed
        head = _run(x2[:r_main], None if r2 is None else r2[:r_main])
        tail = _run(x2[r_main:], None if r2 is None else r2[r_main:])
        out2 = jnp.concatenate([head, tail], axis=0)
    else:
        out2 = _run(x2, r2)

    return out2.reshape(orig_shape)


# ----------------------------- self-test --------------------------------------
if __name__ == "__main__":
    key = jax.random.PRNGKey(0)
    k1, k2, k3, k4, k5, k6 = jax.random.split(key, 6)

    # 1) small (B, N, D) with D < 128, rows divisible by the fold factor
    B, N, D = 2, 8, 32
    x = jax.random.normal(k1, (B, N, D), dtype=jnp.float32)
    gamma = 1e-5 * jnp.ones((D,), dtype=jnp.float32)
    y = jax.block_until_ready(layer_scale(x, gamma))
    assert y.shape == x.shape and y.dtype == x.dtype
    assert jnp.allclose(y, x * gamma, atol=0, rtol=0)

    # 2) D multiple of 128, ragged multi-step grid (masked last block)
    xb = jax.random.normal(k2, (2, 50, 128), dtype=jnp.float32)
    gb = jax.random.normal(k3, (128,), dtype=jnp.float32)
    yb = jax.block_until_ready(layer_scale(xb, gb, target_block_bytes=8 * 128 * 4))
    assert yb.shape == xb.shape and yb.dtype == xb.dtype
    assert jnp.allclose(yb, xb * gb, atol=0, rtol=0)

    # 3) fused residual add (out = residual + gamma * x)
    xc = jax.random.normal(k4, (2, 8, 128), dtype=jnp.float32)
    rc = jax.random.normal(k5, (2, 8, 128), dtype=jnp.float32)
    gc = 1e-5 * jnp.ones((128,), dtype=jnp.float32)
    yc = jax.block_until_ready(layer_scale(xc, gc, residual=rc))
    assert jnp.allclose(yc, rc + xc * gc, rtol=1e-6, atol=1e-6)

    # 4) small-D ragged rows -> lane-dense prefix + tiny masked tail
    xd = jax.random.normal(k6, (2, 25, 32), dtype=jnp.float32)  # rows=50, fold=4
    yd = jax.block_until_ready(layer_scale(xd, gamma))
    assert yd.shape == xd.shape and yd.dtype == xd.dtype
    assert jnp.allclose(yd, xd * gamma, atol=0, rtol=0)

    # 5) bf16 x with f32 gamma + donated-input (aliased output) path
    xe = jax.random.normal(k1, (4, 16, 256), dtype=jnp.bfloat16)
    ge = jax.random.normal(k2, (256,), dtype=jnp.float32)
    ye = jax.block_until_ready(layer_scale(xe, ge, donate_x=True))
    assert ye.shape == xe.shape and ye.dtype == jnp.bfloat16
    ref_e = (xe * ge).astype(jnp.bfloat16)
    assert jnp.allclose(ye.astype(jnp.float32), ref_e.astype(jnp.float32),
                        atol=0, rtol=0)

    print("KERNEL_OK")
</pallas_src>

<mosaic_0001>
module attributes {stable_mosaic.version = 11 : i64} {
  func.func @_scale_kernel(%arg0: i32, %arg1: memref<4x128xf32, #tpu.memory_space<vmem>>, %arg2: memref<1x128xf32, #tpu.memory_space<vmem>>, %arg3: memref<4x128xf32, #tpu.memory_space<vmem>>) attributes {dimension_semantics = [#tpu.dimension_semantics<parallel>], iteration_bounds = array<i64: 1>, scalar_prefetch = 0 : i64, scratch_operands = 0 : i64, tpu.core_type = #tpu.core_type<tc>, window_params = [{transform_indices = @transform_0, window_bounds = array<i64: 4, 128>}, {pipeline_mode = #tpu.pipeline_mode<synchronous>, transform_indices = @transform_1, window_bounds = array<i64: 1, 128>}, {transform_indices = @transform_2, window_bounds = array<i64: 4, 128>}]} {
    %c0 = arith.constant 0 : index
    %c0_0 = arith.constant 0 : index
    %0 = vector.load %arg1[%c0, %c0_0] : memref<4x128xf32, #tpu.memory_space<vmem>>, vector<4x128xf32>
    %c0_1 = arith.constant 0 : index
    %c0_2 = arith.constant 0 : index
    %1 = vector.load %arg2[%c0_1, %c0_2] : memref<1x128xf32, #tpu.memory_space<vmem>>, vector<1x128xf32>
    %2 = vector.broadcast %1 : vector<1x128xf32> to vector<4x128xf32>
    %3 = arith.mulf %0, %2 : vector<4x128xf32>
    %c0_3 = arith.constant 0 : index
    %c0_4 = arith.constant 0 : index
    %4 = vector.load %arg3[%c0_3, %c0_4] : memref<4x128xf32, #tpu.memory_space<vmem>>, vector<4x128xf32>
    tpu.vector_store %arg3[%c0_3, %c0_4], %3 {strides = array<i32>} : memref<4x128xf32, #tpu.memory_space<vmem>>, vector<4x128xf32>,
    return
  }
  func.func @transform_0(%arg0: i32) -> (i32, i32) {
    %c0_i32 = arith.constant 0 : i32
    %c0_i32_0 = arith.constant 0 : i32
    return %arg0, %c0_i32 : i32, i32
  }
  func.func @transform_1(%arg0: i32) -> (i32, i32) {
    %c0_i32 = arith.constant 0 : i32
    %c0_i32_0 = arith.constant 0 : i32
    %c0_i32_1 = arith.constant 0 : i32
    return %c0_i32, %c0_i32_0 : i32, i32
  }
  func.func @transform_2(%arg0: i32) -> (i32, i32) {
    %c0_i32 = arith.constant 0 : i32
    %c0_i32_0 = arith.constant 0 : i32
    return %arg0, %c0_i32 : i32, i32
  }
}

</mosaic_0001>

<bundles_post_ra>
// kernel: tpu_custom_call.1
= control target key start
LH: loop header
LB: loop body
LE: loop exit
PB: predicated region body
PF: predicated region fallthrough
CT: control target
= control target key end

     0   :  { %7 = vsyncpa [#allocation3], 0  ;;  %s144_s0 = inlined_call_operand.hbm [shape: f32[4,128], index: 0, kind: input, shape index: {}]   ;;  %s145_s1 = inlined_call_operand.vmem [shape: f32[1,128], index: 1, kind: input, shape index: {}]   ;;  %s146_s2 = inlined_call_operand.hbm [shape: f32[4,128], index: 2, kind: output, shape index: {}]  }
   0x1   :  { %8 = vsyncpa [#allocation4], 0  ;;  %s100_s9 = smov [#allocation2]   ;;  %s52_s13 = scalar_lea.hbm %s144_s0, 64 }
   0x2   :  { %s15_s10 = sshll.u32 %s100_s9, 4  ;;  %p53_p0 = scmp.ne.s32.totalorder %s144_s0, %s52_s13  ;;  %s16_s10 = int_to_ptr.vmem [resolvable:$true] %s15_s10 }
   0x3   :  { %p56_p1 = scmp.lt.u32.totalorder %s52_s13, %s144_s0 }
   0x5   :  { %p58_p2 = pnand %p56_p1, %p53_p0 }
   0x7   :  { %61 = shalt.err (!%p58_p2)
}
   0x8   :  { %s62_s18 = scalar_lea.vmem %s16_s10, 64  ;;  %p67_p4 = scmp.lt.s32.totalorder %s16_s10, %s16_s10 }
   0x9   :  { %p63_p3 = scmp.ne.s32.totalorder %s16_s10, %s62_s18  ;;  %p68_p5 = scmp.lt.s32.totalorder %s62_s18, %s62_s18 }
   0xb   :  { %p69_p6 = por %p68_p5, %p67_p4 }
   0xd   :  { %p70_p7 = pnand %p69_p6, %p63_p3 }
   0xf   :  { %73 = shalt.err (!%p70_p7)
}
  0x10   :  { %18 = dma.hbm_to_vmem [thread:$0]  %s144_s0, 64, %s16_s10, [#allocation3]  }
  0x11   :  { %96 = dma.done.wait [#allocation3], 64  }
  0x12   :  { %97 = vsyncadd [#allocation3], 4294967232  ;;  %s101_s21 = smov [#allocation5]   ;;  %v24_v0 = vld [vmem:[#allocation2] sm:$0xf] }
  0x13   :  { %s40_s22 = sshll.u32 %s101_s21, 4  ;;  %v49_v1 = vld [vmem:[%s145_s1] ss:$0 sm:$0xff]  ;;  %s41_s22 = int_to_ptr.vmem [resolvable:$true] %s40_s22 }
  0x14   :  { %v32_v2 = vmul.f32 %v49_v1, %v24_v0  ;;  %s74_s25 = scalar_lea.vmem %s41_s22, 64  ;;  %p79_p9 = scmp.lt.s32.totalorder %s41_s22, %s41_s22 }
  0x15   :  { %p75_p8 = scmp.ne.s32.totalorder %s41_s22, %s74_s25  ;;  %p80_p10 = scmp.lt.s32.totalorder %s74_s25, %s74_s25 }
  0x16   :  { %33 = vst [vmem:[#allocation5] sm:$0xf] %v32_v2 }
  0x17   :  { %p81_p11 = por %p80_p10, %p79_p9 }
  0x19   :  { %p82_p12 = pnand %p81_p11, %p75_p8 }
  0x1b   :  { %85 = shalt.err (!%p82_p12)
}
  0x1c   :  { %s86_s27 = scalar_lea.hbm %s146_s2, 64 }
  0x1d   :  { %p87_p13 = scmp.ne.s32.totalorder %s146_s2, %s86_s27  ;;  %p90_p0 = scmp.lt.u32.totalorder %s86_s27, %s146_s2 }
  0x1f   :  { %p92_p1 = pnand %p90_p0, %p87_p13 }
  0x21   :  { %95 = shalt.err (!%p92_p1)
}
  0x22   :  { %43 = dma.vmem_to_hbm [thread:$0]  %s41_s22, 64, %s146_s2, [#allocation4]  }
  0x23   :  { %98 = dma.done.wait [#allocation4], 64  }
  0x24   :  { %99 = vsyncadd [#allocation4], 4294967232 }
  0x25   :  { %47 = vsyncpa [#allocation3], 1 }
  0x26   :  { %48 = vsyncpa [#allocation4], 1 }

</bundles_post_ra>
